<compile_context>
chip_gen: v5e
topology: v5e:2x2
jax: 0.10.0
libtpu: 0.0.40
codegen_flags: <defaults>
</compile_context>

<pallas_src>
import jax
import jax.numpy as jnp
from jax.experimental import pallas as pl
from jax.experimental.pallas import tpu as pltpu

_BN_EPS = 1e-5


# ------------------------------ fused kernel -------------------------------

def _make_fused_kernel(layer_has_bn, matmul_dtype=None):
    """Build a fused kernel body for a fixed stack structure.

    Ref layout:
      x_ref,
      per BN layer      : [w, gamma, beta]      (bias dropped — cancelled by BN)
      per non-BN layer  : [w, b]
      o_ref
    """
    layer_has_bn = tuple(layer_has_bn)

    def kernel(*refs):
        x_ref = refs[0]
        o_ref = refs[-1]
        params = refs[1:-1]

        y = x_ref[...]
        idx = 0
        for has_bn in layer_has_bn:
            w = params[idx][...]
            idx += 1
            lhs = y.astype(matmul_dtype) if matmul_dtype is not None else y
            # MXU matmul, f32 accumulate.
            y = jnp.dot(lhs, w, preferred_element_type=jnp.float32)
            if has_bn:
                g = params[idx][...]
                beta = params[idx + 1][...]
                idx += 2
                # BatchNorm1d (training mode) folded into one scale + add:
                #   out = (y - mean) * (g * rsqrt(var + eps)) + beta
                # Linear bias was dropped upstream: it cancels in (y - mean).
                mean = jnp.mean(y, axis=0, keepdims=True)        # (1, F)
                yc = y - mean                                    # reused
                var = jnp.mean(yc * yc, axis=0, keepdims=True)   # biased var
                scale = g * jax.lax.rsqrt(var + _BN_EPS)         # EUP slot
                y = jnp.maximum(yc * scale + beta, 0.0)          # BN + ReLU
            else:
                b = params[idx][...]
                idx += 1
                y = y + b                                        # (1,F) bcast
        o_ref[...] = y.astype(o_ref.dtype)

    return kernel


# --------------------------- parameter construction ------------------------

def _init_linear(key, in_f, out_f):
    """PyTorch-style deterministic init: U(-1/sqrt(in), 1/sqrt(in))."""
    kw, kb = jax.random.split(key)
    bound = 1.0 / jnp.sqrt(jnp.float32(in_f))
    w = jax.random.uniform(kw, (in_f, out_f), jnp.float32, -bound, bound)
    b = jax.random.uniform(kb, (1, out_f), jnp.float32, -bound, bound)
    return w, b


def build_ae_params(key, in_size, hidden_units, bottle_neck_units):
    encode_units = [in_size] + hidden_units + [bottle_neck_units]
    decode_units = [bottle_neck_units] + hidden_units[::-1] + [in_size]

    def build_stack(key, units):
        layers = []
        n_lin = len(units) - 1
        keys = jax.random.split(key, n_lin)
        for i, (it, ot) in enumerate(zip(units[:-1], units[1:])):
            w, b = _init_linear(keys[i], it, ot)
            has_bn_relu = i < n_lin - 1
            if has_bn_relu:
                gamma = jnp.ones((1, ot), jnp.float32)
                beta = jnp.zeros((1, ot), jnp.float32)
            else:
                gamma = beta = None
            layers.append(dict(w=w, b=b, gamma=gamma, beta=beta,
                               bn_relu=has_bn_relu))
        return layers

    k_enc, k_dec = jax.random.split(key)
    return build_stack(k_enc, encode_units), build_stack(k_dec, decode_units)


def _flatten_params(layers, matmul_dtype=None):
    """Flatten params for the kernel. Biases on BN layers are dropped
    (mathematically cancelled by the mean subtraction)."""
    flat, has_bn = [], []
    for layer in layers:
        w = layer["w"]
        if matmul_dtype is not None:
            w = w.astype(matmul_dtype)   # halve weight VMEM footprint
        flat.append(w)
        if layer["bn_relu"]:
            flat.extend([layer["gamma"], layer["beta"]])
        else:
            flat.append(layer["b"])
        has_bn.append(layer["bn_relu"])
    return flat, has_bn


# ------------------------------- forward pass -------------------------------

def ae_forward(x, encode_layers, decode_layers, *, matmul_dtype=None):
    """Fused AE forward.  `matmul_dtype=jnp.bfloat16` enables the bf16 MXU
    path for v6e/v7x at realistic batch sizes (accumulation and BN stay f32)."""
    layers = list(encode_layers) + list(decode_layers)
    flat, has_bn = _flatten_params(layers, matmul_dtype)
    kernel = _make_fused_kernel(has_bn, matmul_dtype)

    n = x.shape[0]
    out_f = layers[-1]["w"].shape[1]

    flops = sum(2 * n * l["w"].shape[0] * l["w"].shape[1] for l in layers)
    # one rsqrt per BN feature
    transcendentals = sum(l["w"].shape[1] for l in layers if l["bn_relu"])
    bytes_accessed = ((x.size + n * out_f) * 4
                      + sum(int(p.size) * p.dtype.itemsize for p in flat))

    return pl.pallas_call(
        kernel,
        out_shape=jax.ShapeDtypeStruct((n, out_f), jnp.float32),
        cost_estimate=pl.CostEstimate(
            flops=flops,
            transcendentals=transcendentals,
            bytes_accessed=bytes_accessed,
        ),
        compiler_params=pltpu.CompilerParams(
            # Tiny working set; explicit limit keeps v7x (64 MiB physical VMEM,
            # 32 MiB scoped default) safely within budget if shapes grow.
            vmem_limit_bytes=32 * 1024 * 1024,
        ),
    )(x, *flat)


# Pure-JAX reference with exact PyTorch semantics (including the redundant
# bias on BN layers) — used only as a correctness check.
def _ref_stack(x, layers):
    for layer in layers:
        y = x @ layer["w"] + layer["b"]
        if layer["bn_relu"]:
            mean = jnp.mean(y, axis=0, keepdims=True)
            var = jnp.mean((y - mean) ** 2, axis=0, keepdims=True)
            y = (y - mean) / jnp.sqrt(var + _BN_EPS)
            y = layer["gamma"] * y + layer["beta"]
            y = jnp.maximum(y, 0.0)
        x = y
    return x


if __name__ == "__main__":
    # Small shapes consistent with the module's forward:
    # AEModel(inSize=16, hidden_units=[32, 16], bottle_neck_units=8), batch=8.
    in_size = 16
    hidden_units = [32, 16]
    bottle_neck_units = 8
    batch = 8

    key = jax.random.PRNGKey(0)
    k_params, k_x = jax.random.split(key)
    encode_layers, decode_layers = build_ae_params(
        k_params, in_size, hidden_units, bottle_neck_units)

    x = jax.random.normal(k_x, (batch, in_size), jnp.float32)

    out = ae_forward(x, encode_layers, decode_layers)
    out = jax.block_until_ready(out)

    ref = _ref_stack(_ref_stack(x, encode_layers), decode_layers)
    assert out.shape == (batch, in_size)
    # Kernel drops the (mathematically cancelled) bias on BN layers and uses
    # rsqrt vs /sqrt -> tiny fp differences only; keep tolerance at 1e-4.
    assert jnp.allclose(out, ref, rtol=1e-4, atol=1e-4), "mismatch vs JAX reference"

    print("KERNEL_OK")
</pallas_src>

<mosaic_0001>
module attributes {stable_mosaic.version = 11 : i64} {
  func.func @kernel(%arg0: memref<8x16xf32, #tpu.memory_space<vmem>>, %arg1: memref<16x32xf32, #tpu.memory_space<vmem>>, %arg2: memref<1x32xf32, #tpu.memory_space<vmem>>, %arg3: memref<1x32xf32, #tpu.memory_space<vmem>>, %arg4: memref<32x16xf32, #tpu.memory_space<vmem>>, %arg5: memref<1x16xf32, #tpu.memory_space<vmem>>, %arg6: memref<1x16xf32, #tpu.memory_space<vmem>>, %arg7: memref<16x8xf32, #tpu.memory_space<vmem>>, %arg8: memref<1x8xf32, #tpu.memory_space<vmem>>, %arg9: memref<8x16xf32, #tpu.memory_space<vmem>>, %arg10: memref<1x16xf32, #tpu.memory_space<vmem>>, %arg11: memref<1x16xf32, #tpu.memory_space<vmem>>, %arg12: memref<16x32xf32, #tpu.memory_space<vmem>>, %arg13: memref<1x32xf32, #tpu.memory_space<vmem>>, %arg14: memref<1x32xf32, #tpu.memory_space<vmem>>, %arg15: memref<32x16xf32, #tpu.memory_space<vmem>>, %arg16: memref<1x16xf32, #tpu.memory_space<vmem>>, %arg17: memref<8x16xf32, #tpu.memory_space<vmem>>) attributes {dimension_semantics = [], scalar_prefetch = 0 : i64, scratch_operands = 0 : i64, tpu.core_type = #tpu.core_type<tc>} {
    %c0 = arith.constant 0 : index
    %c0_0 = arith.constant 0 : index
    %0 = vector.load %arg0[%c0, %c0_0] : memref<8x16xf32, #tpu.memory_space<vmem>>, vector<8x16xf32>
    %c0_1 = arith.constant 0 : index
    %c0_2 = arith.constant 0 : index
    %1 = vector.load %arg1[%c0_1, %c0_2] : memref<16x32xf32, #tpu.memory_space<vmem>>, vector<16x32xf32>
    %cst = arith.constant dense<0.000000e+00> : vector<8x32xf32>
    %2 = tpu.matmul %0, %1, %cst {dimension_numbers = #tpu.dot_dimension_numbers<[1], [0], [0], [1], [0, 0, 1, 1], [], []>} : vector<8x16xf32>, vector<16x32xf32>, vector<8x32xf32> -> vector<8x32xf32>
    %c0_3 = arith.constant 0 : index
    %c0_4 = arith.constant 0 : index
    %3 = vector.load %arg2[%c0_3, %c0_4] : memref<1x32xf32, #tpu.memory_space<vmem>>, vector<1x32xf32>
    %c0_5 = arith.constant 0 : index
    %c0_6 = arith.constant 0 : index
    %4 = vector.load %arg3[%c0_5, %c0_6] : memref<1x32xf32, #tpu.memory_space<vmem>>, vector<1x32xf32>
    %cst_7 = arith.constant dense<0.000000e+00> : vector<32xf32>
    %5 = vector.multi_reduction <add>, %2, %cst_7 [0] : vector<8x32xf32> to vector<32xf32>
    %6 = vector.shape_cast %5 : vector<32xf32> to vector<1x32xf32>
    %cst_8 = arith.constant 8.000000e+00 : f32
    %7 = vector.broadcast %cst_8 : f32 to vector<1x32xf32>
    %8 = arith.divf %6, %7 : vector<1x32xf32>
    %9 = vector.broadcast %8 : vector<1x32xf32> to vector<8x32xf32>
    %10 = arith.subf %2, %9 : vector<8x32xf32>
    %11 = arith.mulf %10, %10 : vector<8x32xf32>
    %cst_9 = arith.constant dense<0.000000e+00> : vector<32xf32>
    %12 = vector.multi_reduction <add>, %11, %cst_9 [0] : vector<8x32xf32> to vector<32xf32>
    %13 = vector.shape_cast %12 : vector<32xf32> to vector<1x32xf32>
    %cst_10 = arith.constant 8.000000e+00 : f32
    %14 = vector.broadcast %cst_10 : f32 to vector<1x32xf32>
    %15 = arith.divf %13, %14 : vector<1x32xf32>
    %cst_11 = arith.constant 9.99999974E-6 : f32
    %16 = vector.broadcast %cst_11 : f32 to vector<1x32xf32>
    %17 = arith.addf %15, %16 : vector<1x32xf32>
    %18 = math.rsqrt %17 : vector<1x32xf32>
    %19 = arith.mulf %3, %18 : vector<1x32xf32>
    %20 = vector.broadcast %19 : vector<1x32xf32> to vector<8x32xf32>
    %21 = arith.mulf %10, %20 : vector<8x32xf32>
    %22 = vector.broadcast %4 : vector<1x32xf32> to vector<8x32xf32>
    %23 = arith.addf %21, %22 : vector<8x32xf32>
    %cst_12 = arith.constant 0.000000e+00 : f32
    %24 = vector.broadcast %cst_12 : f32 to vector<8x32xf32>
    %25 = arith.maximumf %23, %24 : vector<8x32xf32>
    %c0_13 = arith.constant 0 : index
    %c0_14 = arith.constant 0 : index
    %26 = vector.load %arg4[%c0_13, %c0_14] : memref<32x16xf32, #tpu.memory_space<vmem>>, vector<32x16xf32>
    %cst_15 = arith.constant dense<0.000000e+00> : vector<8x16xf32>
    %27 = tpu.matmul %25, %26, %cst_15 {dimension_numbers = #tpu.dot_dimension_numbers<[1], [0], [0], [1], [0, 0, 1, 1], [], []>} : vector<8x32xf32>, vector<32x16xf32>, vector<8x16xf32> -> vector<8x16xf32>
    %c0_16 = arith.constant 0 : index
    %c0_17 = arith.constant 0 : index
    %28 = vector.load %arg5[%c0_16, %c0_17] : memref<1x16xf32, #tpu.memory_space<vmem>>, vector<1x16xf32>
    %c0_18 = arith.constant 0 : index
    %c0_19 = arith.constant 0 : index
    %29 = vector.load %arg6[%c0_18, %c0_19] : memref<1x16xf32, #tpu.memory_space<vmem>>, vector<1x16xf32>
    %cst_20 = arith.constant dense<0.000000e+00> : vector<16xf32>
    %30 = vector.multi_reduction <add>, %27, %cst_20 [0] : vector<8x16xf32> to vector<16xf32>
    %31 = vector.shape_cast %30 : vector<16xf32> to vector<1x16xf32>
    %cst_21 = arith.constant 8.000000e+00 : f32
    %32 = vector.broadcast %cst_21 : f32 to vector<1x16xf32>
    %33 = arith.divf %31, %32 : vector<1x16xf32>
    %34 = vector.broadcast %33 : vector<1x16xf32> to vector<8x16xf32>
    %35 = arith.subf %27, %34 : vector<8x16xf32>
    %36 = arith.mulf %35, %35 : vector<8x16xf32>
    %cst_22 = arith.constant dense<0.000000e+00> : vector<16xf32>
    %37 = vector.multi_reduction <add>, %36, %cst_22 [0] : vector<8x16xf32> to vector<16xf32>
    %38 = vector.shape_cast %37 : vector<16xf32> to vector<1x16xf32>
    %cst_23 = arith.constant 8.000000e+00 : f32
    %39 = vector.broadcast %cst_23 : f32 to vector<1x16xf32>
    %40 = arith.divf %38, %39 : vector<1x16xf32>
    %cst_24 = arith.constant 9.99999974E-6 : f32
    %41 = vector.broadcast %cst_24 : f32 to vector<1x16xf32>
    %42 = arith.addf %40, %41 : vector<1x16xf32>
    %43 = math.rsqrt %42 : vector<1x16xf32>
    %44 = arith.mulf %28, %43 : vector<1x16xf32>
    %45 = vector.broadcast %44 : vector<1x16xf32> to vector<8x16xf32>
    %46 = arith.mulf %35, %45 : vector<8x16xf32>
    %47 = vector.broadcast %29 : vector<1x16xf32> to vector<8x16xf32>
    %48 = arith.addf %46, %47 : vector<8x16xf32>
    %cst_25 = arith.constant 0.000000e+00 : f32
    %49 = vector.broadcast %cst_25 : f32 to vector<8x16xf32>
    %50 = arith.maximumf %48, %49 : vector<8x16xf32>
    %c0_26 = arith.constant 0 : index
    %c0_27 = arith.constant 0 : index
    %51 = vector.load %arg7[%c0_26, %c0_27] : memref<16x8xf32, #tpu.memory_space<vmem>>, vector<16x8xf32>
    %cst_28 = arith.constant dense<0.000000e+00> : vector<8x8xf32>
    %52 = tpu.matmul %50, %51, %cst_28 {dimension_numbers = #tpu.dot_dimension_numbers<[1], [0], [0], [1], [0, 0, 1, 1], [], []>} : vector<8x16xf32>, vector<16x8xf32>, vector<8x8xf32> -> vector<8x8xf32>
    %c0_29 = arith.constant 0 : index
    %c0_30 = arith.constant 0 : index
    %53 = vector.load %arg8[%c0_29, %c0_30] : memref<1x8xf32, #tpu.memory_space<vmem>>, vector<1x8xf32>
    %54 = vector.broadcast %53 : vector<1x8xf32> to vector<8x8xf32>
    %55 = arith.addf %52, %54 : vector<8x8xf32>
    %c0_31 = arith.constant 0 : index
    %c0_32 = arith.constant 0 : index
    %56 = vector.load %arg9[%c0_31, %c0_32] : memref<8x16xf32, #tpu.memory_space<vmem>>, vector<8x16xf32>
    %cst_33 = arith.constant dense<0.000000e+00> : vector<8x16xf32>
    %57 = tpu.matmul %55, %56, %cst_33 {dimension_numbers = #tpu.dot_dimension_numbers<[1], [0], [0], [1], [0, 0, 1, 1], [], []>} : vector<8x8xf32>, vector<8x16xf32>, vector<8x16xf32> -> vector<8x16xf32>
    %c0_34 = arith.constant 0 : index
    %c0_35 = arith.constant 0 : index
    %58 = vector.load %arg10[%c0_34, %c0_35] : memref<1x16xf32, #tpu.memory_space<vmem>>, vector<1x16xf32>
    %c0_36 = arith.constant 0 : index
    %c0_37 = arith.constant 0 : index
    %59 = vector.load %arg11[%c0_36, %c0_37] : memref<1x16xf32, #tpu.memory_space<vmem>>, vector<1x16xf32>
    %cst_38 = arith.constant dense<0.000000e+00> : vector<16xf32>
    %60 = vector.multi_reduction <add>, %57, %cst_38 [0] : vector<8x16xf32> to vector<16xf32>
    %61 = vector.shape_cast %60 : vector<16xf32> to vector<1x16xf32>
    %cst_39 = arith.constant 8.000000e+00 : f32
    %62 = vector.broadcast %cst_39 : f32 to vector<1x16xf32>
    %63 = arith.divf %61, %62 : vector<1x16xf32>
    %64 = vector.broadcast %63 : vector<1x16xf32> to vector<8x16xf32>
    %65 = arith.subf %57, %64 : vector<8x16xf32>
    %66 = arith.mulf %65, %65 : vector<8x16xf32>
    %cst_40 = arith.constant dense<0.000000e+00> : vector<16xf32>
    %67 = vector.multi_reduction <add>, %66, %cst_40 [0] : vector<8x16xf32> to vector<16xf32>
    %68 = vector.shape_cast %67 : vector<16xf32> to vector<1x16xf32>
    %cst_41 = arith.constant 8.000000e+00 : f32
    %69 = vector.broadcast %cst_41 : f32 to vector<1x16xf32>
    %70 = arith.divf %68, %69 : vector<1x16xf32>
    %cst_42 = arith.constant 9.99999974E-6 : f32
    %71 = vector.broadcast %cst_42 : f32 to vector<1x16xf32>
    %72 = arith.addf %70, %71 : vector<1x16xf32>
    %73 = math.rsqrt %72 : vector<1x16xf32>
    %74 = arith.mulf %58, %73 : vector<1x16xf32>
    %75 = vector.broadcast %74 : vector<1x16xf32> to vector<8x16xf32>
    %76 = arith.mulf %65, %75 : vector<8x16xf32>
    %77 = vector.broadcast %59 : vector<1x16xf32> to vector<8x16xf32>
    %78 = arith.addf %76, %77 : vector<8x16xf32>
    %cst_43 = arith.constant 0.000000e+00 : f32
    %79 = vector.broadcast %cst_43 : f32 to vector<8x16xf32>
    %80 = arith.maximumf %78, %79 : vector<8x16xf32>
    %c0_44 = arith.constant 0 : index
    %c0_45 = arith.constant 0 : index
    %81 = vector.load %arg12[%c0_44, %c0_45] : memref<16x32xf32, #tpu.memory_space<vmem>>, vector<16x32xf32>
    %cst_46 = arith.constant dense<0.000000e+00> : vector<8x32xf32>
    %82 = tpu.matmul %80, %81, %cst_46 {dimension_numbers = #tpu.dot_dimension_numbers<[1], [0], [0], [1], [0, 0, 1, 1], [], []>} : vector<8x16xf32>, vector<16x32xf32>, vector<8x32xf32> -> vector<8x32xf32>
    %c0_47 = arith.constant 0 : index
    %c0_48 = arith.constant 0 : index
    %83 = vector.load %arg13[%c0_47, %c0_48] : memref<1x32xf32, #tpu.memory_space<vmem>>, vector<1x32xf32>
    %c0_49 = arith.constant 0 : index
    %c0_50 = arith.constant 0 : index
    %84 = vector.load %arg14[%c0_49, %c0_50] : memref<1x32xf32, #tpu.memory_space<vmem>>, vector<1x32xf32>
    %cst_51 = arith.constant dense<0.000000e+00> : vector<32xf32>
    %85 = vector.multi_reduction <add>, %82, %cst_51 [0] : vector<8x32xf32> to vector<32xf32>
    %86 = vector.shape_cast %85 : vector<32xf32> to vector<1x32xf32>
    %cst_52 = arith.constant 8.000000e+00 : f32
    %87 = vector.broadcast %cst_52 : f32 to vector<1x32xf32>
    %88 = arith.divf %86, %87 : vector<1x32xf32>
    %89 = vector.broadcast %88 : vector<1x32xf32> to vector<8x32xf32>
    %90 = arith.subf %82, %89 : vector<8x32xf32>
    %91 = arith.mulf %90, %90 : vector<8x32xf32>
    %cst_53 = arith.constant dense<0.000000e+00> : vector<32xf32>
    %92 = vector.multi_reduction <add>, %91, %cst_53 [0] : vector<8x32xf32> to vector<32xf32>
    %93 = vector.shape_cast %92 : vector<32xf32> to vector<1x32xf32>
    %cst_54 = arith.constant 8.000000e+00 : f32
    %94 = vector.broadcast %cst_54 : f32 to vector<1x32xf32>
    %95 = arith.divf %93, %94 : vector<1x32xf32>
    %cst_55 = arith.constant 9.99999974E-6 : f32
    %96 = vector.broadcast %cst_55 : f32 to vector<1x32xf32>
    %97 = arith.addf %95, %96 : vector<1x32xf32>
    %98 = math.rsqrt %97 : vector<1x32xf32>
    %99 = arith.mulf %83, %98 : vector<1x32xf32>
    %100 = vector.broadcast %99 : vector<1x32xf32> to vector<8x32xf32>
    %101 = arith.mulf %90, %100 : vector<8x32xf32>
    %102 = vector.broadcast %84 : vector<1x32xf32> to vector<8x32xf32>
    %103 = arith.addf %101, %102 : vector<8x32xf32>
    %cst_56 = arith.constant 0.000000e+00 : f32
    %104 = vector.broadcast %cst_56 : f32 to vector<8x32xf32>
    %105 = arith.maximumf %103, %104 : vector<8x32xf32>
    %c0_57 = arith.constant 0 : index
    %c0_58 = arith.constant 0 : index
    %106 = vector.load %arg15[%c0_57, %c0_58] : memref<32x16xf32, #tpu.memory_space<vmem>>, vector<32x16xf32>
    %cst_59 = arith.constant dense<0.000000e+00> : vector<8x16xf32>
    %107 = tpu.matmul %105, %106, %cst_59 {dimension_numbers = #tpu.dot_dimension_numbers<[1], [0], [0], [1], [0, 0, 1, 1], [], []>} : vector<8x32xf32>, vector<32x16xf32>, vector<8x16xf32> -> vector<8x16xf32>
    %c0_60 = arith.constant 0 : index
    %c0_61 = arith.constant 0 : index
    %108 = vector.load %arg16[%c0_60, %c0_61] : memref<1x16xf32, #tpu.memory_space<vmem>>, vector<1x16xf32>
    %109 = vector.broadcast %108 : vector<1x16xf32> to vector<8x16xf32>
    %110 = arith.addf %107, %109 : vector<8x16xf32>
    %c0_62 = arith.constant 0 : index
    %c0_63 = arith.constant 0 : index
    %111 = vector.load %arg17[%c0_62, %c0_63] : memref<8x16xf32, #tpu.memory_space<vmem>>, vector<8x16xf32>
    tpu.vector_store %arg17[%c0_62, %c0_63], %110 {strides = array<i32>} : memref<8x16xf32, #tpu.memory_space<vmem>>, vector<8x16xf32>,
    return
  }
}

</mosaic_0001>

<bundles_post_ra>
// kernel: tpu_custom_call.1
= control target key start
LH: loop header
LB: loop body
LE: loop exit
PB: predicated region body
PF: predicated region fallthrough
CT: control target
= control target key end

     0   :  { %s657_s0 = inlined_call_operand.vmem [shape: f32[8,16], index: 0, kind: input, shape index: {}]   ;;  %s658_s1 = inlined_call_operand.vmem [shape: f32[16,32], index: 1, kind: input, shape index: {}]   ;;  %s659_s2 = inlined_call_operand.vmem [shape: f32[1,32], index: 2, kind: input, shape index: {}]   ;;  %s660_s3 = inlined_call_operand.vmem [shape: f32[1,32], index: 3, kind: input, shape index: {}]   ;;  %s661_s4 = inlined_call_operand.vmem [shape: f32[32,16], index: 4, kind: input, shape index: {}]   ;;  %s662_s5 = inlined_call_operand.vmem [shape: f32[1,16], index: 5, kind: input, shape index: {}]   ;;  %s663_s6 = inlined_call_operand.vmem [shape: f32[1,16], index: 6, kind: input, shape index: {}]   ;;  %s664_s7 = inlined_call_operand.vmem [shape: f32[16,8], index: 7, kind: input, shape index: {}]   ;;  %s665_s8 = inlined_call_operand.vmem [shape: f32[1,8], index: 8, kind: input, shape index: {}]   ;;  %s666_s9 = inlined_call_operand.vmem [shape: f32[8,16], index: 9, kind: input, shape index: {}]   ;;  %s667_s10 = inlined_call_operand.vmem [shape: f32[1,16], index: 10, kind: input, shape index: {}]   ;;  %s668_s11 = inlined_call_operand.vmem [shape: f32[1,16], index: 11, kind: input, shape index: {}]   ;;  %s669_s12 = inlined_call_operand.vmem [shape: f32[16,32], index: 12, kind: input, shape index: {}]   ;;  %s670_s13 = inlined_call_operand.vmem [shape: f32[1,32], index: 13, kind: input, shape index: {}]   ;;  %s671_s14 = inlined_call_operand.vmem [shape: f32[1,32], index: 14, kind: input, shape index: {}]   ;;  %s672_s15 = inlined_call_operand.vmem [shape: f32[32,16], index: 15, kind: input, shape index: {}]   ;;  %s673_s16 = inlined_call_operand.vmem [shape: f32[1,16], index: 16, kind: input, shape index: {}]   ;;  %s674_s17 = inlined_call_operand.hbm [shape: f32[8,16], index: 17, kind: output, shape index: {}]  }
   0x1   :  { %676 = sst [smem:[#allocation5_spill]] %s657_s0 }
   0x2   :  { %677 = sst [smem:[#allocation6_spill]] %s658_s1 }
   0x3   :  { %s678_s26 = sld [smem:[#allocation6_spill]]  ;;  %vm60_vm0 = vcmask 130048  }
   0x4   :  { %s679_s30 = sld [smem:[#allocation5_spill]] }
   0x9   :  { %v59_v0 = vld [vmem:[%s678_s26 + $0x8] sm:$0xff]  ;;  %v58_v1 = vld [vmem:[%s678_s26] sm:$0xff] }
   0xa   :  { %v57_v2 = vld [vmem:[%s679_s30] sm:$0xff]  ;;  %78 = vmatpush.msra.mxu0 %v59_v0 }
   0xc   :  { %79 = vmatpush.msra.mxu0 %v58_v1 }
   0xd   :  { %22 = vsyncpa [#allocation3], 0  ;;  %410 = vmatmul.msk.f32.vlgmr.msra.gmra.mxu0 %vm60_vm0, %v57_v2  ;;  %v460_v3 = vmov 8.0   ;;  %vm86_vm1 = vcmask 261120   ;;  %v136_v25 = vld [vmem:[%s661_s4 + $0x18] sm:$0xff]  ;;  %v135_v27 = vld [vmem:[%s661_s4 + $0x10] sm:$0xff] }
   0xe   :  { %424 = vrcp.f32 %v460_v3  ;;  %152 = vmatpush.msra.mxu1 %v136_v25  ;;  %v134_v28 = vld [vmem:[%s661_s4 + $0x8] sm:$0xff]  ;;  %v133_v30 = vld [vmem:[%s661_s4] sm:$0xff]  ;;  %vm231_vm9 = vcmask 64512  }
   0xf   :  { %v84_v39 = vld [vmem:[%s659_s2] sm:$0x1]  ;;  %v202_v0 = vld [vmem:[%s664_s7 + $0x8] sm:$0xff] }
  0x10   :  { %153 = vmatpush.msra.mxu1 %v135_v27  ;;  %v418_v44 = vld [vmem:[%s660_s3] ss:$0 sm:$0xff]  ;;  %224 = vmatpush.msra.mxu2 %v202_v0 }
  0x11   :  { %v201_v1 = vld [vmem:[%s664_s7] sm:$0xff] }
  0x12   :  { %154 = vmatpush.msra.mxu1 %v134_v28  ;;  %225 = vmatpush.msra.mxu2 %v201_v1 }
  0x14   :  { %v425_v4 = vpop.eup %424  ;;  %155 = vmatpush.msra.mxu1 %v133_v30 }
  0x15   :  { %v95_v5 = vmul.f32 8.0, %v425_v4  ;;  %vm99_vm2 = vweird.f32 %v425_v4 }
  0x17   :  { %v96_v6 = vsub.f32 1.0, %v95_v5 }
  0x19   :  { %v97_v10 = vmul.f32 %v425_v4, %v96_v6 }
  0x1b   :  { %v98_v13 = vadd.f32 %v425_v4, %v97_v10 }
  0x1d   :  { %v563_v16 = vsel %vm99_vm2, %v425_v4, %v98_v13 }
  0x8a   :  { %v81_v7 = vpop.f32.mrf.mxu0 }
  0x8b   :  { %v87_v8 = vsel %vm86_vm1, %v81_v7, 0.0 }
  0x8c   :  { %v88_v9 = vrot.slane %v87_v8, 4 }
  0x8e   :  { %v89_v11 = vadd.f32 %v88_v9, %v87_v8 }
  0x90   :  { %v90_v12 = vrot.slane %v89_v11, 2 }
  0x92   :  { %v91_v14 = vadd.f32 %v90_v12, %v89_v11  ;;  %v160_v11 = vld [vmem:[%s662_s5] sm:$0x1]  ;;  %s401_s5 = sshll.u32 %s674_s17, 4  ;;  %s402_s5 = int_to_ptr.hbm [resolvable:$true] %s401_s5 }
  0x94   :  { %v92_v15 = vrot.slane %v91_v14, 1 }
  0x96   :  { %v93_v17 = vadd.f32 %v92_v15, %v91_v14 }
  0x98   :  { %v101_v18 = vmul.f32 %v563_v16, %v93_v17  ;;  %v419_v17 = vld [vmem:[%s663_s6] ss:$0 sm:$0xff] }
  0x9a   :  { %v102_v19 = vsub.f32 %v81_v7, %v101_v18 }
  0x9c   :  { %v103_v20 = vmul.f32 %v102_v19, %v102_v19 }
  0x9e   :  { %v104_v21 = vsel %vm86_vm1, %v103_v20, 0.0 }
  0x9f   :  { %v105_v22 = vrot.slane %v104_v21, 4 }
  0xa1   :  { %v106_v23 = vadd.f32 %v105_v22, %v104_v21  ;;  %v230_v21 = vld [vmem:[%s666_s9] sm:$0xff] }
  0xa2   :  { %250 = vmatpush.msra.mxu3 %v230_v21  ;;  %v420_v22 = vld [vmem:[%s665_s8] ss:$0 sm:$0xff] }
  0xa3   :  { %v107_v24 = vrot.slane %v106_v23, 2 }
  0xa5   :  { %v108_v26 = vadd.f32 %v107_v24, %v106_v23 }
  0xa7   :  { %v109_v29 = vrot.slane %v108_v26, 1 }
  0xa9   :  { %v110_v31 = vadd.f32 %v109_v29, %v108_v26 }
  0xab   :  { %v111_v32 = vmul.f32 %v110_v31, %v563_v16 }
  0xad   :  { %v112_v33 = vadd.f32 1e-05, %v111_v32 }
  0xaf   :  { %426 = vrsqrt.f32 %v112_v33  ;;  %vm119_vm4 = vweird.f32 %v112_v33 }
  0xb5   :  { %v427_v34 = vpop.eup %426 }
  0xb6   :  { %v114_v35 = vmul.f32 %v427_v34, %v112_v33  ;;  %vm120_vm3 = vweird.f32 %v427_v34 }
  0xb7   :  { %vm121_vm5 = vmor %vm119_vm4, %vm120_vm3 }
  0xb8   :  { %v115_v36 = vmul.f32 %v427_v34, %v114_v35 }
  0xba   :  { %v116_v37 = vmul.f32 0.5, %v115_v36 }
  0xbc   :  { %v117_v38 = vsub.f32 1.5, %v116_v37 }
  0xbe   :  { %v118_v40 = vmul.f32 %v427_v34, %v117_v38 }
  0xc0   :  { %v122_v41 = vsel %vm121_vm5, %v427_v34, %v118_v40 }
  0xc1   :  { %v123_v42 = vmul.f32 %v122_v41, %v84_v39 }
  0xc3   :  { %v125_v43 = vperm.slane %v123_v42, 0  ;;  %v297_v42 = vld [vmem:[%s669_s12 + $0x8] sm:$0xff] }
  0xc4   :  { %315 = vmatpush.msrb.mxu3 %v297_v42 }
  0xc5   :  { %v127_v45 = vmul.f32 %v125_v43, %v102_v19 }
  0xc7   :  { %v131_v46 = vadd.f32 %v418_v44, %v127_v45  ;;  %v296_v44 = vld [vmem:[%s669_s12] sm:$0xff] }
  0xc8   :  { %316 = vmatpush.msrb.mxu3 %v296_v44 }
  0xc9   :  { %v132_v47 = vmax.f32 %v131_v46, 0.0 }
  0xcb   :  { %411 = vmatmul.msk.f32.vlgmr.msra.gmra.mxu1 %vm86_vm1, %v132_v47 }
 0x148   :  { %v157_v48 = vpop.f32.mrf.mxu1 }
 0x149   :  { %v162_v49 = vsel %vm60_vm0, %v157_v48, 0.0 }
 0x14a   :  { %v163_v50 = vrot.slane %v162_v49, 4 }
 0x14c   :  { %v164_v51 = vadd.f32 %v163_v50, %v162_v49 }
 0x14e   :  { %v165_v52 = vrot.slane %v164_v51, 2 }
 0x150   :  { %v166_v53 = vadd.f32 %v165_v52, %v164_v51  ;;  %v255_v52 = vld [vmem:[%s667_s10] sm:$0x1] }
 0x152   :  { %v167_v54 = vrot.slane %v166_v53, 1 }
 0x154   :  { %v168_v55 = vadd.f32 %v167_v54, %v166_v53 }
 0x156   :  { %v169_v56 = vmul.f32 %v168_v55, %v563_v16 }
 0x158   :  { %v170_v57 = vsub.f32 %v157_v48, %v169_v56 }
 0x15a   :  { %v171_v58 = vmul.f32 %v170_v57, %v170_v57 }
 0x15c   :  { %v172_v59 = vsel %vm60_vm0, %v171_v58, 0.0 }
 0x15d   :  { %v173_v60 = vrot.slane %v172_v59, 4 }
 0x15f   :  { %v174_v61 = vadd.f32 %v173_v60, %v172_v59 }
 0x161   :  { %v175_v62 = vrot.slane %v174_v61, 2 }
 0x163   :  { %v176_v63 = vadd.f32 %v175_v62, %v174_v61 }
 0x165   :  { %v177_v2 = vrot.slane %v176_v63, 1 }
 0x167   :  { %v178_v3 = vadd.f32 %v177_v2, %v176_v63 }
 0x169   :  { %v179_v4 = vmul.f32 %v178_v3, %v563_v16 }
 0x16b   :  { %v180_v5 = vadd.f32 1e-05, %v179_v4 }
 0x16d   :  { %428 = vrsqrt.f32 %v180_v5  ;;  %vm187_vm7 = vweird.f32 %v180_v5 }
 0x173   :  { %v429_v6 = vpop.eup %428 }
 0x174   :  { %v182_v7 = vmul.f32 %v429_v6, %v180_v5  ;;  %vm188_vm6 = vweird.f32 %v429_v6 }
 0x175   :  { %vm189_vm8 = vmor %vm187_vm7, %vm188_vm6 }
 0x176   :  { %v183_v8 = vmul.f32 %v429_v6, %v182_v7 }
 0x178   :  { %v184_v9 = vmul.f32 0.5, %v183_v8 }
 0x17a   :  { %v185_v10 = vsub.f32 1.5, %v184_v9 }
 0x17c   :  { %v186_v12 = vmul.f32 %v429_v6, %v185_v10 }
 0x17e   :  { %v190_v13 = vsel %vm189_vm8, %v429_v6, %v186_v12  ;;  %v365_v12 = vld [vmem:[%s672_s15 + $0x18] sm:$0xff] }
 0x17f   :  { %v191_v14 = vmul.f32 %v190_v13, %v160_v11  ;;  %385 = vmatpush.msrb.mxu0 %v365_v12 }
 0x181   :  { %v193_v15 = vperm.slane %v191_v14, 0  ;;  %v364_v14 = vld [vmem:[%s672_s15 + $0x10] sm:$0xff] }
 0x182   :  { %386 = vmatpush.msrb.mxu0 %v364_v14 }
 0x183   :  { %v195_v18 = vmul.f32 %v193_v15, %v170_v57  ;;  %v421_v57 = vld [vmem:[%s668_s11] ss:$0 sm:$0xff] }
 0x185   :  { %v199_v19 = vadd.f32 %v419_v17, %v195_v18  ;;  %v363_v17 = vld [vmem:[%s672_s15 + $0x8] sm:$0xff] }
 0x186   :  { %387 = vmatpush.msrb.mxu0 %v363_v17 }
 0x187   :  { %v200_v20 = vmax.f32 %v199_v19, 0.0  ;;  %v362_v19 = vld [vmem:[%s672_s15] sm:$0xff] }
 0x188   :  { %388 = vmatpush.msrb.mxu0 %v362_v19 }
 0x189   :  { %412 = vmatmul.msk.f32.vlgmr.msra.gmra.mxu2 %vm60_vm0, %v200_v20 }
 0x20c   :  { %v227_v23 = vpop.f32.mrf.mxu2 }
 0x20d   :  { %v228_v24 = vadd.f32 %v420_v22, %v227_v23 }
 0x20f   :  { %413 = vmatmul.msk.f32.vlgmr.msra.gmra.mxu3 %vm231_vm9, %v228_v24 }
 0x292   :  { %v252_v25 = vpop.f32.mrf.mxu3 }
 0x293   :  { %v257_v26 = vsel %vm60_vm0, %v252_v25, 0.0 }
 0x294   :  { %v258_v27 = vrot.slane %v257_v26, 4 }
 0x296   :  { %v259_v28 = vadd.f32 %v258_v27, %v257_v26  ;;  %v321_v27 = vld [vmem:[%s670_s13] sm:$0x1]  ;;  %s461_s13 = smov [#allocation2]  }
 0x297   :  { %s399_s18 = sshll.u32 %s461_s13, 4  ;;  %s400_s18 = int_to_ptr.vmem [resolvable:$true] %s399_s18 }
 0x298   :  { %v260_v29 = vrot.slane %v259_v28, 2 }
 0x29a   :  { %v261_v30 = vadd.f32 %v260_v29, %v259_v28 }
 0x29c   :  { %v262_v31 = vrot.slane %v261_v30, 1 }
 0x29e   :  { %v263_v32 = vadd.f32 %v262_v31, %v261_v30 }
 0x2a0   :  { %v264_v33 = vmul.f32 %v263_v32, %v563_v16 }
 0x2a2   :  { %v265_v34 = vsub.f32 %v252_v25, %v264_v33 }
 0x2a4   :  { %v266_v35 = vmul.f32 %v265_v34, %v265_v34 }
 0x2a6   :  { %v267_v36 = vsel %vm60_vm0, %v266_v35, 0.0  ;;  %v423_v35 = vld [vmem:[%s673_s16] ss:$0 sm:$0xff] }
 0x2a7   :  { %v268_v37 = vrot.slane %v267_v36, 4 }
 0x2a9   :  { %v269_v38 = vadd.f32 %v268_v37, %v267_v36 }
 0x2ab   :  { %v270_v39 = vrot.slane %v269_v38, 2 }
 0x2ad   :  { %v271_v40 = vadd.f32 %v270_v39, %v269_v38 }
 0x2af   :  { %v272_v41 = vrot.slane %v271_v40, 1 }
 0x2b1   :  { %v273_v43 = vadd.f32 %v272_v41, %v271_v40 }
 0x2b3   :  { %v274_v45 = vmul.f32 %v273_v43, %v563_v16 }
 0x2b5   :  { %v275_v46 = vadd.f32 1e-05, %v274_v45 }
 0x2b7   :  { %430 = vrsqrt.f32 %v275_v46  ;;  %vm282_vm11 = vweird.f32 %v275_v46 }
 0x2bd   :  { %v431_v47 = vpop.eup %430 }
 0x2be   :  { %v277_v48 = vmul.f32 %v431_v47, %v275_v46  ;;  %vm283_vm10 = vweird.f32 %v431_v47 }
 0x2bf   :  { %vm284_vm12 = vmor %vm282_vm11, %vm283_vm10 }
 0x2c0   :  { %v278_v49 = vmul.f32 %v431_v47, %v277_v48 }
 0x2c2   :  { %v279_v50 = vmul.f32 0.5, %v278_v49 }
 0x2c4   :  { %v280_v51 = vsub.f32 1.5, %v279_v50 }
 0x2c6   :  { %v281_v53 = vmul.f32 %v431_v47, %v280_v51 }
 0x2c8   :  { %v285_v54 = vsel %vm284_vm12, %v431_v47, %v281_v53 }
 0x2c9   :  { %v286_v55 = vmul.f32 %v285_v54, %v255_v52 }
 0x2cb   :  { %v288_v56 = vperm.slane %v286_v55, 0 }
 0x2cd   :  { %v290_v58 = vmul.f32 %v288_v56, %v265_v34 }
 0x2cf   :  { %v294_v59 = vadd.f32 %v421_v57, %v290_v58 }
 0x2d1   :  { %v295_v60 = vmax.f32 %v294_v59, 0.0 }
 0x2d3   :  { %414 = vmatmul.msk.f32.vlgmr.msrb.gmra.mxu3 %vm60_vm0, %v295_v60 }
 0x356   :  { %v318_v61 = vpop.f32.mrf.mxu3 }
 0x357   :  { %v323_v62 = vsel %vm86_vm1, %v318_v61, 0.0 }
 0x358   :  { %v324_v63 = vrot.slane %v323_v62, 4 }
 0x35a   :  { %v325_v0 = vadd.f32 %v324_v63, %v323_v62 }
 0x35c   :  { %v326_v1 = vrot.slane %v325_v0, 2 }
 0x35e   :  { %v327_v2 = vadd.f32 %v326_v1, %v325_v0 }
 0x360   :  { %v328_v3 = vrot.slane %v327_v2, 1 }
 0x362   :  { %v329_v4 = vadd.f32 %v328_v3, %v327_v2 }
 0x364   :  { %v330_v5 = vmul.f32 %v329_v4, %v563_v16 }
 0x366   :  { %v331_v6 = vsub.f32 %v318_v61, %v330_v5 }
 0x368   :  { %v332_v7 = vmul.f32 %v331_v6, %v331_v6 }
 0x36a   :  { %v333_v8 = vsel %vm86_vm1, %v332_v7, 0.0 }
 0x36b   :  { %v334_v9 = vrot.slane %v333_v8, 4 }
 0x36d   :  { %v335_v10 = vadd.f32 %v334_v9, %v333_v8 }
 0x36f   :  { %v336_v11 = vrot.slane %v335_v10, 2 }
 0x371   :  { %v337_v13 = vadd.f32 %v336_v11, %v335_v10 }
 0x373   :  { %v338_v15 = vrot.slane %v337_v13, 1 }
 0x375   :  { %v339_v18 = vadd.f32 %v338_v15, %v337_v13 }
 0x377   :  { %v340_v20 = vmul.f32 %v339_v18, %v563_v16  ;;  %v422_v16 = vld [vmem:[%s671_s14] ss:$0 sm:$0xff] }
 0x379   :  { %v341_v21 = vadd.f32 1e-05, %v340_v20 }
 0x37b   :  { %432 = vrsqrt.f32 %v341_v21  ;;  %vm348_vm14 = vweird.f32 %v341_v21 }
 0x381   :  { %v433_v22 = vpop.eup %432 }
 0x382   :  { %v343_v23 = vmul.f32 %v433_v22, %v341_v21  ;;  %vm349_vm13 = vweird.f32 %v433_v22 }
 0x383   :  { %vm350_vm15 = vmor %vm348_vm14, %vm349_vm13 }
 0x384   :  { %v344_v24 = vmul.f32 %v433_v22, %v343_v23 }
 0x386   :  { %v345_v25 = vmul.f32 0.5, %v344_v24 }
 0x388   :  { %v346_v26 = vsub.f32 1.5, %v345_v25 }
 0x38a   :  { %v347_v28 = vmul.f32 %v433_v22, %v346_v26 }
 0x38c   :  { %v351_v29 = vsel %vm350_vm15, %v433_v22, %v347_v28 }
 0x38d   :  { %v352_v30 = vmul.f32 %v351_v29, %v321_v27 }
 0x38f   :  { %v354_v31 = vperm.slane %v352_v30, 0 }
 0x391   :  { %v356_v32 = vmul.f32 %v354_v31, %v331_v6 }
 0x393   :  { %v360_v33 = vadd.f32 %v422_v16, %v356_v32 }
 0x395   :  { %v361_v34 = vmax.f32 %v360_v33, 0.0 }
 0x397   :  { %415 = vmatmul.msk.f32.vlgmr.msrb.gmra.mxu0 %vm86_vm1, %v361_v34 }
 0x414   :  { %v390_v36 = vpop.f32.mrf.mxu0 }
 0x415   :  { %v391_v37 = vadd.f32 %v423_v35, %v390_v36 }
 0x417   :  { %393 = vst.msk [vmem:[#allocation2] sm:$0xff] %vm60_vm0, %v391_v37 }
 0x418   :  { %404 = dma.vmem_to_hbm [thread:$0]  %s400_s18, 128, %s402_s5, [#allocation3]  }
 0x419   :  { %458 = dma.done.wait [#allocation3], 128  }
 0x41a   :  { %459 = vsyncadd [#allocation3], 4294967168 }
 0x41b   :  { %409 = vsyncpa [#allocation3], 1 }

</bundles_post_ra>
